<compile_context>
chip_gen: v7x
topology: tpu7x:2x2x1
jax: 0.10.0
libtpu: 0.0.40
codegen_flags: <defaults>
</compile_context>

<pallas_src>
import functools

import jax
import jax.numpy as jnp
from jax.experimental import pallas as pl
from jax.experimental.pallas import tpu as pltpu


def _round_up(n, m):
    return (n + m - 1) // m * m


# ----------------------------- Pallas kernel ---------------------------------
def _critic_kernel(dims, rows, sa_ref, w_ref, v_ref, out_ref):
    """One batch tile: trunk (Linear+LN+tanh) + fused ensemble Q MLP + min."""
    repr_dim, state_dim, action_dim, hidden, num_q = dims
    r_wt, r_w1s, r_w1a, r_w2, r_w3 = rows            # static row offsets in w_ref
    H2 = num_q * hidden                               # fused hidden width

    state = sa_ref[:, :repr_dim]                      # (TB, repr_dim)   f32
    action = sa_ref[:, repr_dim:]                     # (TB, action_dim) f32

    # --- trunk: Linear(repr_dim -> state_dim) + LayerNorm + tanh -------------
    wt = w_ref[r_wt:r_wt + repr_dim, :state_dim]      # bf16 MXU operand
    z = jnp.dot(state.astype(wt.dtype), wt, preferred_element_type=jnp.float32)
    z = z + v_ref[0:1, :state_dim]                    # trunk bias (f32)
    # single-pass LayerNorm stats: two independent lane reductions (no chain)
    inv_n = 1.0 / state_dim
    mean = jnp.sum(z, axis=-1, keepdims=True) * inv_n
    ex2 = jnp.sum(z * z, axis=-1, keepdims=True) * inv_n
    var = jnp.maximum(ex2 - mean * mean, 0.0)
    z = (z - mean) * jax.lax.rsqrt(var + 1e-5)        # torch LayerNorm eps
    z = z * v_ref[1:2, :state_dim] + v_ref[2:3, :state_dim]
    st = jnp.tanh(z)                                  # (TB, state_dim) f32

    # --- fused ensemble layer 1: split dot instead of concat([st, action]) ---
    w1s = w_ref[r_w1s:r_w1s + state_dim, :H2]
    w1a = w_ref[r_w1a:r_w1a + action_dim, :H2]
    h = (jnp.dot(st.astype(w1s.dtype), w1s, preferred_element_type=jnp.float32)
         + jnp.dot(action.astype(w1a.dtype), w1a, preferred_element_type=jnp.float32)
         + v_ref[3:4, :H2])
    h = jnp.maximum(h, 0.0)

    # --- fused ensemble layer 2: block-diagonal weights ----------------------
    w2 = w_ref[r_w2:r_w2 + H2, :H2]
    h = jnp.dot(h.astype(w2.dtype), w2, preferred_element_type=jnp.float32)
    h = jnp.maximum(h + v_ref[4:5, :H2], 0.0)

    # --- fused heads: one (H2, num_q) matmul, then min over the ensemble -----
    w3 = w_ref[r_w3:r_w3 + H2, :num_q]
    q = jnp.dot(h.astype(w3.dtype), w3, preferred_element_type=jnp.float32)
    q = q + v_ref[5:6, :num_q]                        # (TB, num_q) f32
    out_ref[...] = jnp.min(q, axis=-1, keepdims=True) # (TB, 1) — no lane relayout


# --------------------------- parameter packing --------------------------------
def pack_params(p, *, repr_dim, state_dim, action_dim, hidden, num_q,
                mxu_dtype=jnp.bfloat16):
    """Fuse the ensemble + pack everything into 2 arrays (1 weight slab, 1 vector slab)."""
    assert p["w3"].shape[-1] == 1, "kernel implements the output_dim=1 (min) path"
    H2 = num_q * hidden
    C = _round_up(max(state_dim, H2), 128)            # full-lane-tile slab width

    # fuse the num_q ensembles into one matmul chain
    w1 = jnp.concatenate([p["w1"][e] for e in range(num_q)], axis=1)   # (state+A, H2)
    w1_s, w1_a = w1[:state_dim], w1[state_dim:]
    w2 = jnp.zeros((H2, H2), jnp.float32)
    w3 = jnp.zeros((H2, num_q), jnp.float32)
    for e in range(num_q):
        w2 = w2.at[e * hidden:(e + 1) * hidden, e * hidden:(e + 1) * hidden].set(p["w2"][e])
        w3 = w3.at[e * hidden:(e + 1) * hidden, e:e + 1].set(p["w3"][e])
    b1 = jnp.concatenate([p["b1"][e][0] for e in range(num_q)])        # (H2,)
    b2 = jnp.concatenate([p["b2"][e][0] for e in range(num_q)])        # (H2,)
    b3 = jnp.stack([p["b3"][e][0, 0] for e in range(num_q)])           # (num_q,)

    # row layout of the packed weight slab (16-row aligned segments: bf16 sublane tile)
    r_wt = 0
    r_w1s = r_wt + _round_up(repr_dim, 16)
    r_w1a = r_w1s + _round_up(state_dim, 16)
    r_w2 = r_w1a + _round_up(action_dim, 16)
    r_w3 = r_w2 + _round_up(H2, 16)
    R = r_w3 + _round_up(H2, 16)

    wpack = jnp.zeros((R, C), jnp.float32)
    wpack = wpack.at[r_wt:r_wt + repr_dim, :state_dim].set(p["wt"])
    wpack = wpack.at[r_w1s:r_w1s + state_dim, :H2].set(w1_s)
    wpack = wpack.at[r_w1a:r_w1a + action_dim, :H2].set(w1_a)
    wpack = wpack.at[r_w2:r_w2 + H2, :H2].set(w2)
    wpack = wpack.at[r_w3:r_w3 + H2, :num_q].set(w3)
    wpack = wpack.astype(mxu_dtype)                                    # bf16 MXU operands

    def row(v):
        return jnp.zeros((C,), jnp.float32).at[:v.shape[0]].set(v)

    vpack = jnp.stack([row(p["bt"][0]), row(p["gamma"][0]), row(p["beta"][0]),
                       row(b1), row(b2), row(b3)])                     # (6, C) f32
    rows = (r_wt, r_w1s, r_w1a, r_w2, r_w3)
    return wpack, vpack, rows


# ------------------------------- wrapper --------------------------------------
def ensemble_critic_forward(state, action, wpack, vpack, rows, *,
                            repr_dim, state_dim, action_dim, hidden, num_q,
                            block_b=512):
    B = state.shape[0]
    # adaptive tile: never pad a small batch up to a huge tile
    block_b = max(128, min(_round_up(block_b, 128), _round_up(max(B, 1), 128)))
    # v7x megacore: prefer >= 2 grid steps when the batch allows it
    if _round_up(B, block_b) == block_b and block_b >= 256:
        block_b //= 2
    assert block_b % 128 == 0                         # lane/sublane tile constraint
    B_pad = _round_up(max(B, 1), block_b)
    nb = B_pad // block_b

    # single fused input (one DMA stream instead of two; no padded action tile)
    sa = jnp.concatenate([state, action], axis=-1)    # (B, repr_dim + action_dim)
    if B_pad != B:                                    # pad batch tail; rows discarded below
        sa = jnp.pad(sa, ((0, B_pad - B), (0, 0)))
    sa_dim = repr_dim + action_dim

    dims = (repr_dim, state_dim, action_dim, hidden, num_q)
    kernel = functools.partial(_critic_kernel, dims, rows)

    grid_spec = pltpu.PrefetchScalarGridSpec(
        num_scalar_prefetch=0,
        grid=(nb,),
        in_specs=[
            pl.BlockSpec((block_b, sa_dim), lambda i: (i, 0)),
            # parameters: full-array blocks + constant index_map -> VMEM-resident
            pl.BlockSpec(wpack.shape, lambda i: (0, 0)),
            pl.BlockSpec(vpack.shape, lambda i: (0, 0)),
        ],
        out_specs=pl.BlockSpec((block_b, 1), lambda i: (i, 0)),
    )
    q = pl.pallas_call(
        kernel,
        out_shape=jax.ShapeDtypeStruct((B_pad, 1), jnp.float32),
        grid_spec=grid_spec,
        compiler_params=pltpu.CompilerParams(
            dimension_semantics=("parallel",),   # batch axis -> megacore on v7x
        ),
    )(sa, wpack, vpack)
    # torch: q (num_q, B, 1) -> squeeze(-1) -> min(dim=0)[0] -> (B,)
    return q[:B, 0]


# ------------------------- deterministic parameter init -----------------------
def init_params(key, repr_dim, state_dim, action_dim, hidden_dim, num_q, output_dim):
    ks = jax.random.split(key, 8)
    s = 0.1
    return {
        # trunk Linear(repr_dim, state_dim) + LayerNorm(state_dim)
        "wt": s * jax.random.normal(ks[0], (repr_dim, state_dim), jnp.float32),
        "bt": s * jax.random.normal(ks[1], (1, state_dim), jnp.float32),
        "gamma": jnp.ones((1, state_dim), jnp.float32),
        "beta": jnp.zeros((1, state_dim), jnp.float32),
        # ensemble Q: (state_dim + A) -> hidden -> hidden -> output_dim
        "w1": s * jax.random.normal(ks[2], (num_q, state_dim + action_dim, hidden_dim), jnp.float32),
        "b1": s * jax.random.normal(ks[3], (num_q, 1, hidden_dim), jnp.float32),
        "w2": s * jax.random.normal(ks[4], (num_q, hidden_dim, hidden_dim), jnp.float32),
        "b2": s * jax.random.normal(ks[5], (num_q, 1, hidden_dim), jnp.float32),
        "w3": s * jax.random.normal(ks[6], (num_q, hidden_dim, output_dim), jnp.float32),
        "b3": s * jax.random.normal(ks[7], (num_q, 1, output_dim), jnp.float32),
    }


# --------------------------- pure-JAX reference --------------------------------
def reference_forward(state, action, p, *, num_q, mxu_dtype=jnp.bfloat16):
    # mirrors the kernel's bf16 MXU-operand rounding (accumulation stays f32)
    def q16(x):
        return x.astype(mxu_dtype).astype(jnp.float32)

    z = q16(state) @ q16(p["wt"]) + p["bt"]
    mean = z.mean(-1, keepdims=True)
    var = ((z - mean) ** 2).mean(-1, keepdims=True)
    z = (z - mean) * jax.lax.rsqrt(var + 1e-5) * p["gamma"] + p["beta"]
    sa = jnp.concatenate([jnp.tanh(z), action], -1)
    qs = []
    for e in range(num_q):
        h = jnp.maximum(q16(sa) @ q16(p["w1"][e]) + p["b1"][e], 0.0)
        h = jnp.maximum(q16(h) @ q16(p["w2"][e]) + p["b2"][e], 0.0)
        qs.append(q16(h) @ q16(p["w3"][e]) + p["b3"][e])
    q = jnp.stack(qs, 0)[..., 0]          # (num_q, B)
    return q.min(axis=0)                  # (B,)


# ---------------------------------- main ---------------------------------------
if __name__ == "__main__":
    # EnsembleCritic(action_shape=(4,), hidden_dim=32, repr_dim=32,
    #                encoder_feature_dim=32, l=2, num_q=2, output_dim=1)
    B = 8
    repr_dim = 32
    state_dim = 32          # encoder_feature_dim
    action_dim = 4
    hidden_dim = 32
    num_q = 2
    output_dim = 1

    key = jax.random.PRNGKey(0)
    k_obs, k_act, k_par = jax.random.split(key, 3)
    obs = jax.random.normal(k_obs, (B, repr_dim), jnp.float32)     # pre-trunk obs
    action = jax.random.normal(k_act, (B, action_dim), jnp.float32)
    params = init_params(k_par, repr_dim, state_dim, action_dim,
                         hidden_dim, num_q, output_dim)

    wpack, vpack, rows = pack_params(
        params, repr_dim=repr_dim, state_dim=state_dim, action_dim=action_dim,
        hidden=hidden_dim, num_q=num_q)

    q = ensemble_critic_forward(
        obs, action, wpack, vpack, rows,
        repr_dim=repr_dim, state_dim=state_dim, action_dim=action_dim,
        hidden=hidden_dim, num_q=num_q)
    q = jax.block_until_ready(q)

    q_ref = reference_forward(obs, action, params, num_q=num_q)
    assert q.shape == (B,), q.shape
    assert jnp.allclose(q, q_ref, atol=2e-3, rtol=1e-3), (q, q_ref)

    print("KERNEL_OK")
</pallas_src>

<mosaic_0001>
module attributes {stable_mosaic.version = 11 : i64} {
  func.func @_critic_kernel(%arg0: i32, %arg1: memref<128x36xf32, #tpu.memory_space<vmem>>, %arg2: memref<208x128xbf16, #tpu.memory_space<vmem>>, %arg3: memref<6x128xf32, #tpu.memory_space<vmem>>, %arg4: memref<128x1xf32, #tpu.memory_space<vmem>>) attributes {dimension_semantics = [#tpu.dimension_semantics<parallel>], iteration_bounds = array<i64: 1>, scalar_prefetch = 0 : i64, scratch_operands = 0 : i64, tpu.core_type = #tpu.core_type<tc>, window_params = [{transform_indices = @transform_0, window_bounds = array<i64: 128, 36>}, {pipeline_mode = #tpu.pipeline_mode<synchronous>, transform_indices = @transform_1, window_bounds = array<i64: 208, 128>}, {pipeline_mode = #tpu.pipeline_mode<synchronous>, transform_indices = @transform_2, window_bounds = array<i64: 6, 128>}, {transform_indices = @transform_3, window_bounds = array<i64: 128, 1>}]} {
    %c0 = arith.constant 0 : index
    %c0_0 = arith.constant 0 : index
    %0 = vector.load %arg1[%c0, %c0_0] : memref<128x36xf32, #tpu.memory_space<vmem>>, vector<128x32xf32>
    %c0_1 = arith.constant 0 : index
    %c32 = arith.constant 32 : index
    %1 = vector.load %arg1[%c0_1, %c32] : memref<128x36xf32, #tpu.memory_space<vmem>>, vector<128x4xf32>
    %c0_2 = arith.constant 0 : index
    %c0_3 = arith.constant 0 : index
    %2 = vector.load %arg2[%c0_2, %c0_3] : memref<208x128xbf16, #tpu.memory_space<vmem>>, vector<32x32xbf16>
    %3 = arith.truncf %0 : vector<128x32xf32> to vector<128x32xbf16>
    %cst = arith.constant dense<0.000000e+00> : vector<128x32xf32>
    %4 = tpu.matmul %3, %2, %cst {dimension_numbers = #tpu.dot_dimension_numbers<[1], [0], [0], [1], [0, 0, 1, 1], [], []>} : vector<128x32xbf16>, vector<32x32xbf16>, vector<128x32xf32> -> vector<128x32xf32>
    %c0_4 = arith.constant 0 : index
    %c0_5 = arith.constant 0 : index
    %5 = vector.load %arg3[%c0_4, %c0_5] : memref<6x128xf32, #tpu.memory_space<vmem>>, vector<1x32xf32>
    %6 = vector.broadcast %5 : vector<1x32xf32> to vector<128x32xf32>
    %7 = arith.addf %4, %6 : vector<128x32xf32>
    %cst_6 = arith.constant dense<0.000000e+00> : vector<128xf32>
    %8 = vector.multi_reduction <add>, %7, %cst_6 [1] : vector<128x32xf32> to vector<128xf32>
    %9 = vector.shape_cast %8 : vector<128xf32> to vector<128x1xf32>
    %cst_7 = arith.constant 3.125000e-02 : f32
    %10 = vector.broadcast %cst_7 : f32 to vector<128x1xf32>
    %11 = arith.mulf %9, %10 : vector<128x1xf32>
    %12 = arith.mulf %7, %7 : vector<128x32xf32>
    %cst_8 = arith.constant dense<0.000000e+00> : vector<128xf32>
    %13 = vector.multi_reduction <add>, %12, %cst_8 [1] : vector<128x32xf32> to vector<128xf32>
    %14 = vector.shape_cast %13 : vector<128xf32> to vector<128x1xf32>
    %cst_9 = arith.constant 3.125000e-02 : f32
    %15 = vector.broadcast %cst_9 : f32 to vector<128x1xf32>
    %16 = arith.mulf %14, %15 : vector<128x1xf32>
    %17 = arith.mulf %11, %11 : vector<128x1xf32>
    %18 = arith.subf %16, %17 : vector<128x1xf32>
    %cst_10 = arith.constant 0.000000e+00 : f32
    %19 = vector.broadcast %cst_10 : f32 to vector<128x1xf32>
    %20 = arith.maximumf %18, %19 : vector<128x1xf32>
    %21 = vector.broadcast %11 : vector<128x1xf32> to vector<128x32xf32>
    %22 = arith.subf %7, %21 : vector<128x32xf32>
    %cst_11 = arith.constant 9.99999974E-6 : f32
    %23 = vector.broadcast %cst_11 : f32 to vector<128x1xf32>
    %24 = arith.addf %20, %23 : vector<128x1xf32>
    %25 = math.rsqrt %24 : vector<128x1xf32>
    %26 = vector.broadcast %25 : vector<128x1xf32> to vector<128x32xf32>
    %27 = arith.mulf %22, %26 : vector<128x32xf32>
    %c1 = arith.constant 1 : index
    %c0_12 = arith.constant 0 : index
    %28 = vector.load %arg3[%c1, %c0_12] : memref<6x128xf32, #tpu.memory_space<vmem>>, vector<1x32xf32>
    %29 = vector.broadcast %28 : vector<1x32xf32> to vector<128x32xf32>
    %30 = arith.mulf %27, %29 : vector<128x32xf32>
    %c2 = arith.constant 2 : index
    %c0_13 = arith.constant 0 : index
    %31 = vector.load %arg3[%c2, %c0_13] : memref<6x128xf32, #tpu.memory_space<vmem>>, vector<1x32xf32>
    %32 = vector.broadcast %31 : vector<1x32xf32> to vector<128x32xf32>
    %33 = arith.addf %30, %32 : vector<128x32xf32>
    %34 = math.tanh %33 : vector<128x32xf32>
    %c32_14 = arith.constant 32 : index
    %c0_15 = arith.constant 0 : index
    %35 = vector.load %arg2[%c32_14, %c0_15] : memref<208x128xbf16, #tpu.memory_space<vmem>>, vector<32x64xbf16>
    %c64 = arith.constant 64 : index
    %c0_16 = arith.constant 0 : index
    %36 = vector.load %arg2[%c64, %c0_16] : memref<208x128xbf16, #tpu.memory_space<vmem>>, vector<4x64xbf16>
    %37 = arith.truncf %34 : vector<128x32xf32> to vector<128x32xbf16>
    %cst_17 = arith.constant dense<0.000000e+00> : vector<128x64xf32>
    %38 = tpu.matmul %37, %35, %cst_17 {dimension_numbers = #tpu.dot_dimension_numbers<[1], [0], [0], [1], [0, 0, 1, 1], [], []>} : vector<128x32xbf16>, vector<32x64xbf16>, vector<128x64xf32> -> vector<128x64xf32>
    %39 = arith.truncf %1 : vector<128x4xf32> to vector<128x4xbf16>
    %cst_18 = arith.constant dense<0.000000e+00> : vector<128x64xf32>
    %40 = tpu.matmul %39, %36, %cst_18 {dimension_numbers = #tpu.dot_dimension_numbers<[1], [0], [0], [1], [0, 0, 1, 1], [], []>} : vector<128x4xbf16>, vector<4x64xbf16>, vector<128x64xf32> -> vector<128x64xf32>
    %41 = arith.addf %38, %40 : vector<128x64xf32>
    %c3 = arith.constant 3 : index
    %c0_19 = arith.constant 0 : index
    %42 = vector.load %arg3[%c3, %c0_19] : memref<6x128xf32, #tpu.memory_space<vmem>>, vector<1x64xf32>
    %43 = vector.broadcast %42 : vector<1x64xf32> to vector<128x64xf32>
    %44 = arith.addf %41, %43 : vector<128x64xf32>
    %cst_20 = arith.constant 0.000000e+00 : f32
    %45 = vector.broadcast %cst_20 : f32 to vector<128x64xf32>
    %46 = arith.maximumf %44, %45 : vector<128x64xf32>
    %c80 = arith.constant 80 : index
    %c0_21 = arith.constant 0 : index
    %47 = vector.load %arg2[%c80, %c0_21] : memref<208x128xbf16, #tpu.memory_space<vmem>>, vector<64x64xbf16>
    %48 = arith.truncf %46 : vector<128x64xf32> to vector<128x64xbf16>
    %cst_22 = arith.constant dense<0.000000e+00> : vector<128x64xf32>
    %49 = tpu.matmul %48, %47, %cst_22 {dimension_numbers = #tpu.dot_dimension_numbers<[1], [0], [0], [1], [0, 0, 1, 1], [], []>} : vector<128x64xbf16>, vector<64x64xbf16>, vector<128x64xf32> -> vector<128x64xf32>
    %c4 = arith.constant 4 : index
    %c0_23 = arith.constant 0 : index
    %50 = vector.load %arg3[%c4, %c0_23] : memref<6x128xf32, #tpu.memory_space<vmem>>, vector<1x64xf32>
    %51 = vector.broadcast %50 : vector<1x64xf32> to vector<128x64xf32>
    %52 = arith.addf %49, %51 : vector<128x64xf32>
    %cst_24 = arith.constant 0.000000e+00 : f32
    %53 = vector.broadcast %cst_24 : f32 to vector<128x64xf32>
    %54 = arith.maximumf %52, %53 : vector<128x64xf32>
    %c144 = arith.constant 144 : index
    %c0_25 = arith.constant 0 : index
    %55 = vector.load %arg2[%c144, %c0_25] : memref<208x128xbf16, #tpu.memory_space<vmem>>, vector<64x2xbf16>
    %56 = arith.truncf %54 : vector<128x64xf32> to vector<128x64xbf16>
    %cst_26 = arith.constant dense<0.000000e+00> : vector<128x2xf32>
    %57 = tpu.matmul %56, %55, %cst_26 {dimension_numbers = #tpu.dot_dimension_numbers<[1], [0], [0], [1], [0, 0, 1, 1], [], []>} : vector<128x64xbf16>, vector<64x2xbf16>, vector<128x2xf32> -> vector<128x2xf32>
    %c5 = arith.constant 5 : index
    %c0_27 = arith.constant 0 : index
    %58 = vector.load %arg3[%c5, %c0_27] : memref<6x128xf32, #tpu.memory_space<vmem>>, vector<1x2xf32>
    %59 = vector.broadcast %58 : vector<1x2xf32> to vector<128x2xf32>
    %60 = arith.addf %57, %59 : vector<128x2xf32>
    %cst_28 = arith.constant dense<0x7F800000> : vector<128xf32>
    %61 = vector.multi_reduction <minimumf>, %60, %cst_28 [1] : vector<128x2xf32> to vector<128xf32>
    %62 = vector.shape_cast %61 : vector<128xf32> to vector<128x1xf32>
    %c0_29 = arith.constant 0 : index
    %c0_30 = arith.constant 0 : index
    %63 = vector.load %arg4[%c0_29, %c0_30] : memref<128x1xf32, #tpu.memory_space<vmem>>, vector<128x1xf32>
    tpu.vector_store %arg4[%c0_29, %c0_30], %62 {strides = array<i32>} : memref<128x1xf32, #tpu.memory_space<vmem>>, vector<128x1xf32>,
    return
  }
  func.func @transform_0(%arg0: i32) -> (i32, i32) {
    %c0_i32 = arith.constant 0 : i32
    %c0_i32_0 = arith.constant 0 : i32
    return %arg0, %c0_i32 : i32, i32
  }
  func.func @transform_1(%arg0: i32) -> (i32, i32) {
    %c0_i32 = arith.constant 0 : i32
    %c0_i32_0 = arith.constant 0 : i32
    %c0_i32_1 = arith.constant 0 : i32
    return %c0_i32, %c0_i32_0 : i32, i32
  }
  func.func @transform_2(%arg0: i32) -> (i32, i32) {
    %c0_i32 = arith.constant 0 : i32
    %c0_i32_0 = arith.constant 0 : i32
    %c0_i32_1 = arith.constant 0 : i32
    return %c0_i32, %c0_i32_0 : i32, i32
  }
  func.func @transform_3(%arg0: i32) -> (i32, i32) {
    %c0_i32 = arith.constant 0 : i32
    %c0_i32_0 = arith.constant 0 : i32
    return %arg0, %c0_i32 : i32, i32
  }
}

</mosaic_0001>

<bundles_post_ra>
// kernel: tpu_custom_call.1
= control target key start
LH: loop header
LB: loop body
LE: loop exit
PB: predicated region body
PF: predicated region fallthrough
CT: control target
= control target key end

     0   :  { %vm60_vm0 = vcmask 261120   ;;  %s1563_s28 = smov 96   ;;  %vm558_vm1 = vcmask 1041408   ;;  %vm533_vm2 = vcmask 31744   ;;  %vm874_vm3 = vcmask 523264   ;;  %s2131_s1 = inlined_call_operand.vmem [shape: bf16[208,128], index: 1, kind: input, shape index: {}]   ;;  %s2132_s0 = inlined_call_operand.vmem [shape: f32[128,36], index: 0, kind: input, shape index: {}]   ;;  %s2133_s2 = inlined_call_operand.vmem [shape: f32[6,128], index: 2, kind: input, shape index: {}]   ;;  %s2134_s3 = inlined_call_operand.vmem [shape: f32[128,1], index: 3, kind: output, shape index: {}]  }
   0x1   :  { %v1487_v0 = vld [vmem:[%s2131_s1] sm:$0xff]   ;;  %v1488_v1 = vld [vmem:[%s2131_s1 + $0x8] sm:$0xff]   ;;  %v17_v4 = vld [vmem:[%s2132_s0 + $0x10] sm:$0xff]  ;;  %vm1178_vm4 = vcmask 15360   ;;  %vm1227_vm5 = vcmask 7168  }
   0x2   :  { %1359 = vmatprep.subr.bf16.mxu0 %v1487_v0  ;;  %v15_v2 = vld [vmem:[%s2132_s0] sm:$0xff]  ;;  %v16_v3 = vld [vmem:[%s2132_s0 + $0x8] sm:$0xff]  ;;  %v18_v6 = vld [vmem:[%s2132_s0 + $0x18] sm:$0xff] }
   0x3   :  { %1360 = vmatpush3.bf16.msra.mxu0 %v1487_v0  ;;  %v35_v5 = vpack.c.bf16 %v16_v3, %v15_v2  ;;  %v36_v7 = vpack.c.bf16 %v18_v6, %v17_v4  ;;  %v19_v8 = vld [vmem:[%s2132_s0 + $0x20] sm:$0xff]  ;;  %v20_v9 = vld [vmem:[%s2132_s0 + $0x28] sm:$0xff]  ;;  %v21_v11 = vld [vmem:[%s2132_s0 + $0x30] sm:$0xff] }
   0x4   :  { %1361 = vmatprep.subr.bf16.mxu0 %v1488_v1  ;;  %v37_v10 = vpack.c.bf16 %v20_v9, %v19_v8  ;;  %v22_v12 = vld [vmem:[%s2132_s0 + $0x38] sm:$0xff]  ;;  %v23_v13 = vld [vmem:[%s2132_s0 + $0x40] sm:$0xff]  ;;  %v24_v14 = vld [vmem:[%s2132_s0 + $0x48] sm:$0xff] }
   0x5   :  { %1363 = vmatprep.mubr.msk.bf16.mxu0 %vm60_vm0, %v35_v5  ;;  %517 = vrot.lane.b32.xlu0 %v35_v5, %s1563_s28  ;;  %v38_v15 = vpack.c.bf16 %v22_v12, %v21_v11  ;;  %v1627_v16 = vpack.c.bf16 %v24_v14, %v23_v13  ;;  %v25_v17 = vld [vmem:[%s2132_s0 + $0x50] sm:$0xff]  ;;  %v26_v18 = vld [vmem:[%s2132_s0 + $0x58] sm:$0xff]  ;;  %v27_v19 = vld [vmem:[%s2132_s0 + $0x60] sm:$0xff] }
   0x6   :  { %519 = vrot.lane.b32.xlu1 %v36_v7, %s1563_s28  ;;  %v28_v20 = vld [vmem:[%s2132_s0 + $0x68] sm:$0xff]  ;;  %v1644_v21 = vpack.c.bf16 %v26_v18, %v25_v17  ;;  %v29_v23 = vld [vmem:[%s2132_s0 + $0x70] sm:$0xff]  ;;  %v30_v24 = vld [vmem:[%s2132_s0 + $0x78] sm:$0xff] }
   0x7   :  { %1362 = vmatpush3.bf16.msra.mxu0 %v1488_v1  ;;  %v1646_v22 = vpack.c.bf16 %v28_v20, %v27_v19  ;;  %v1658_v25 = vpack.c.bf16 %v30_v24, %v29_v23  ;;  %v500_v26 = vld [vmem:[%s2131_s1 + $0x20] sm:$0x3] }
   0x8   :  { %1485 = vmatprep.subr.msk.bf16.mxu1 %vm558_vm1, %v500_v26  ;;  %v560_v29 = vsel %vm558_vm1, %v500_v26, 0  ;;  %v1672_v32 = vld [vmem:[%s2133_s2] ss:$0 sm:$0xff] }
   0x9   :  { %1380 = vmatpush3.bf16.msra.mxu1 %v560_v29 }
   0xa   :  { %1364 = vmatmul.mubr.msk.bf16.vlgmr.msra.gmra.mrb[0].mxu0 %vm60_vm0, %v36_v7  ;;  %521 = vrot.lane.b32.xlu1 %v37_v10, %s1563_s28 }
   0xb   :  { %1367 = vmatprep.mubr.msk.bf16.mxu0 %vm60_vm0, %v37_v10 }
   0xe   :  { %523 = vrot.lane.b32.xlu1 %v38_v15, %s1563_s28 }
  0x12   :  { %1368 = vmatmul.mubr.msk.bf16.gmra.mrb[4].mxu0 %vm60_vm0, %v38_v15 }
  0x13   :  { %1371 = vmatprep.mubr.msk.bf16.mxu0 %vm60_vm0, %v1627_v16 }
  0x1a   :  { %1372 = vmatmul.mubr.msk.bf16.gmra.mrb[8].mxu0 %vm60_vm0, %v1644_v21 }
  0x1b   :  { %1375 = vmatprep.mubr.msk.bf16.mxu0 %vm60_vm0, %v1646_v22 }
  0x22   :  { %1376 = vmatmul.mubr.msk.bf16.gmra.mrb[12].mxu0 %vm60_vm0, %v1658_v25 }
  0x77   :  { %v518_v27 = vpop.permute.xlu0 %517 }
  0x78   :  { %v520_v28 = vpop.permute.xlu1 %519  ;;  %1381 = vmatprep.mubr.msk.bf16.mxu1 %vm533_vm2, %v518_v27 }
  0x79   :  { %1382 = vmatmul.mubr.msk.bf16.vlgmr.msra.gmra.mrb[0].mxu1 %vm533_vm2, %v520_v28 }
  0x7c   :  { %v522_v30 = vpop.permute.xlu1 %521 }
  0x7d   :  { %1385 = vmatprep.mubr.msk.bf16.mxu1 %vm533_vm2, %v522_v30 }
  0x80   :  { %v524_v31 = vpop.permute.xlu1 %523 }
  0x81   :  { %1386 = vmatmul.mubr.msk.bf16.gmra.mrb[4].mxu1 %vm533_vm2, %v524_v31 }
  0xdd   :  { %v1365_v33 = vpop.f32.mrb[0].mxu0 }
  0xde   :  { %v1675_v34 = vadd.f32 %v1365_v33, %v1672_v32  ;;  %v119_v35 = vpop.f32.mrb[1].mxu0 }
  0xdf   :  { %v1678_v36 = vadd.f32 %v1672_v32, %v119_v35  ;;  %v1366_v37 = vpop.f32.mrb[2].mxu0 }
  0xe0   :  { %v1681_v38 = vadd.f32 %v1366_v37, %v1672_v32  ;;  %v122_v39 = vpop.f32.mrb[3].mxu0  ;;  %v188_v40 = vsel %vm60_vm0, %v1675_v34, 0.0  ;;  %v248_v42 = vmul.f32 %v1675_v34, %v1675_v34 }
  0xe1   :  { %189 = vadd.xlane.f32.xlu1 %v188_v40  ;;  %v182_v41 = vsel %vm60_vm0, %v1678_v36, 0.0  ;;  %v1690_v43 = vadd.f32 %v1672_v32, %v122_v39  ;;  %v246_v54 = vmul.f32 %v1678_v36, %v1678_v36 }
  0xe2   :  { %183 = vadd.xlane.f32.xlu0 %v182_v41  ;;  %v191_v44 = vsel %vm60_vm0, %v1681_v38, 0.0  ;;  %v249_v45 = vmul.f32 %v1681_v38, %v1681_v38  ;;  %v268_v46 = vsel %vm60_vm0, %v248_v42, 0.0 }
  0xe3   :  { %v247_v52 = vmul.f32 %v1690_v43, %v1690_v43  ;;  %v185_v53 = vsel %vm60_vm0, %v1690_v43, 0.0  ;;  %v262_v58 = vsel %vm60_vm0, %v246_v54, 0.0 }
  0xe4   :  { %v271_v50 = vsel %vm60_vm0, %v249_v45, 0.0 }
  0xe5   :  { %192 = vadd.xlane.f32.xlu1 %v191_v44  ;;  %v1369_v47 = vpop.f32.mrb[4].mxu0  ;;  %v265_v56 = vsel %vm60_vm0, %v247_v52, 0.0 }
  0xe6   :  { %269 = vadd.xlane.f32.xlu0 %v268_v46  ;;  %v135_v48 = vpop.f32.mrb[5].mxu0  ;;  %v1709_v57 = vadd.f32 %v1369_v47, %v1672_v32 }
  0xe7   :  { %v1370_v49 = vpop.f32.mrb[6].mxu0  ;;  %v1718_v1 = vadd.f32 %v1672_v32, %v135_v48 }
  0xe8   :  { %v138_v51 = vpop.f32.mrb[7].mxu0  ;;  %v1705_v55 = vadd.f32 %v1370_v49, %v1672_v32  ;;  %v200_v2 = vsel %vm60_vm0, %v1709_v57, 0.0  ;;  %v252_v6 = vmul.f32 %v1709_v57, %v1709_v57 }
  0xe9   :  { %272 = vadd.xlane.f32.xlu1 %v271_v50  ;;  %v1715_v63 = vadd.f32 %v1672_v32, %v138_v51  ;;  %v194_v5 = vsel %vm60_vm0, %v1718_v1, 0.0  ;;  %v250_v14 = vmul.f32 %v1718_v1, %v1718_v1 }
  0xea   :  { %186 = vadd.xlane.f32.xlu0 %v185_v53  ;;  %v203_v60 = vsel %vm60_vm0, %v1705_v55, 0.0  ;;  %v253_v4 = vmul.f32 %v1705_v55, %v1705_v55  ;;  %v280_v13 = vsel %vm60_vm0, %v252_v6, 0.0 }
  0xeb   :  { %v197_v3 = vsel %vm60_vm0, %v1715_v63, 0.0  ;;  %v251_v11 = vmul.f32 %v1715_v63, %v1715_v63  ;;  %v274_v19 = vsel %vm60_vm0, %v250_v14, 0.0 }
  0xec   :  { %v283_v10 = vsel %vm60_vm0, %v253_v4, 0.0 }
  0xed   :  { %266 = vadd.xlane.f32.xlu1 %v265_v56  ;;  %v1373_v59 = vpop.f32.mrb[8].mxu0  ;;  %v277_v17 = vsel %vm60_vm0, %v251_v11, 0.0  ;;  %v1489_v56 = vld [vmem:[%s2131_s1 + $0x10] sm:$0xff]  }
  0xee   :  { %263 = vadd.xlane.f32.xlu0 %v262_v58  ;;  %v151_v61 = vpop.f32.mrb[9].mxu0  ;;  %v1741_v18 = vadd.f32 %v1373_v59, %v1672_v32  ;;  %1397 = vmatprep.subr.bf16.mxu0 %v1489_v56 }
  0xef   :  { %v1374_v62 = vpop.f32.mrb[10].mxu0  ;;  %v1750_v24 = vadd.f32 %v1672_v32, %v151_v61  ;;  %1465 = vmatprep.subr.bf16.mxu1 %v1489_v56  ;;  %1398 = vmatpush3.bf16.msra.mxu0 %v1489_v56  ;;  %v1819_v61 = vld [vmem:[%s2131_s1 + $0x28] sm:$0xff]  }
  0xf0   :  { %v154_v0 = vpop.f32.mrb[11].mxu0  ;;  %v1737_v15 = vadd.f32 %v1374_v62, %v1672_v32  ;;  %v212_v26 = vsel %vm60_vm0, %v1741_v18, 0.0  ;;  %v256_v30 = vmul.f32 %v1741_v18, %v1741_v18  ;;  %1467 = vmatpush3.bf16.msra.mxu1 %v1489_v56 }
  0xf1   :  { %204 = vadd.xlane.f32.xlu1 %v203_v60  ;;  %v1747_v23 = vadd.f32 %v1672_v32, %v154_v0  ;;  %v206_v29 = vsel %vm60_vm0, %v1750_v24, 0.0  ;;  %v254_v37 = vmul.f32 %v1750_v24, %v1750_v24  ;;  %v1490_v60 = vld [vmem:[%s2131_s1 + $0x18] sm:$0xff]  }
  0xf2   :  { %201 = vadd.xlane.f32.xlu0 %v200_v2  ;;  %v215_v20 = vsel %vm60_vm0, %v1737_v15, 0.0  ;;  %v257_v28 = vmul.f32 %v1737_v15, %v1737_v15  ;;  %v292_v35 = vsel %vm60_vm0, %v256_v30, 0.0  ;;  %1399 = vmatprep.subr.bf16.mxu0 %v1490_v60 }
  0xf3   :  { %v209_v27 = vsel %vm60_vm0, %v1747_v23, 0.0  ;;  %v255_v33 = vmul.f32 %v1747_v23, %v1747_v23  ;;  %v286_v42 = vsel %vm60_vm0, %v254_v37, 0.0  ;;  %1466 = vmatprep.subr.bf16.mxu1 %v1490_v60  ;;  %1400 = vmatpush3.bf16.msra.mxu0 %v1490_v60 }
  0xf4   :  { %v295_v31 = vsel %vm60_vm0, %v257_v28, 0.0  ;;  %1468 = vmatpush3.bf16.msra.mxu1 %v1490_v60  ;;  %1417 = vmatprep.subr.bf16.mxu0 %v1819_v61 }
  0xf5   :  { %198 = vadd.xlane.f32.xlu1 %v197_v3  ;;  %v1377_v7 = vpop.f32.mrb[12].mxu0  ;;  %v289_v40 = vsel %vm60_vm0, %v255_v33, 0.0 }
  0xf6   :  { %195 = vadd.xlane.f32.xlu0 %v194_v5  ;;  %v167_v8 = vpop.f32.mrb[13].mxu0  ;;  %v1773_v41 = vadd.f32 %v1377_v7, %v1672_v32 }
  0xf7   :  { %v1378_v9 = vpop.f32.mrb[14].mxu0  ;;  %v1782_v46 = vadd.f32 %v1672_v32, %v167_v8 }
  0xf8   :  { %v170_v12 = vpop.f32.mrb[15].mxu0  ;;  %v1769_v39 = vadd.f32 %v1378_v9, %v1672_v32  ;;  %v224_v47 = vsel %vm60_vm0, %v1773_v41, 0.0  ;;  %v260_v51 = vmul.f32 %v1773_v41, %v1773_v41 }
  0xf9   :  { %284 = vadd.xlane.f32.xlu1 %v283_v10  ;;  %v1779_v45 = vadd.f32 %v1672_v32, %v170_v12  ;;  %v218_v50 = vsel %vm60_vm0, %v1782_v46, 0.0  ;;  %v258_v54 = vmul.f32 %v1782_v46, %v1782_v46 }
  0xfa   :  { %281 = vadd.xlane.f32.xlu0 %v280_v13  ;;  %v227_v44 = vsel %vm60_vm0, %v1769_v39, 0.0  ;;  %v261_v49 = vmul.f32 %v1769_v39, %v1769_v39  ;;  %v304_v53 = vsel %vm60_vm0, %v260_v51, 0.0 }
  0xfb   :  { %v221_v48 = vsel %vm60_vm0, %v1779_v45, 0.0  ;;  %v259_v52 = vmul.f32 %v1779_v45, %v1779_v45  ;;  %v298_v59 = vsel %vm60_vm0, %v258_v54, 0.0 }
  0xfc   :  { %v307_v32 = vsel %vm60_vm0, %v261_v49, 0.0 }
  0xfd   :  { %278 = vadd.xlane.f32.xlu1 %v277_v17  ;;  %v301_v58 = vsel %vm60_vm0, %v259_v52, 0.0 }
  0xfe   :  { %275 = vadd.xlane.f32.xlu0 %v274_v19 }
 0x101   :  { %216 = vadd.xlane.f32.xlu1 %v215_v20 }
 0x102   :  { %213 = vadd.xlane.f32.xlu0 %v212_v26 }
 0x105   :  { %210 = vadd.xlane.f32.xlu1 %v209_v27 }
 0x106   :  { %207 = vadd.xlane.f32.xlu0 %v206_v29 }
 0x109   :  { %296 = vadd.xlane.f32.xlu1 %v295_v31 }
 0x10a   :  { %293 = vadd.xlane.f32.xlu0 %v292_v35 }
 0x10d   :  { %290 = vadd.xlane.f32.xlu1 %v289_v40 }
 0x10e   :  { %287 = vadd.xlane.f32.xlu0 %v286_v42 }
 0x111   :  { %228 = vadd.xlane.f32.xlu1 %v227_v44 }
 0x112   :  { %225 = vadd.xlane.f32.xlu0 %v224_v47 }
 0x115   :  { %222 = vadd.xlane.f32.xlu1 %v221_v48 }
 0x116   :  { %219 = vadd.xlane.f32.xlu0 %v218_v50 }
 0x119   :  { %308 = vadd.xlane.f32.xlu1 %v307_v32 }
 0x11a   :  { %305 = vadd.xlane.f32.xlu0 %v304_v53 }
 0x11d   :  { %302 = vadd.xlane.f32.xlu1 %v301_v58 }
 0x11e   :  { %299 = vadd.xlane.f32.xlu0 %v298_v59 }
 0x12e   :  { %527 = vrot.lane.b32.xlu1 %v1644_v21, %s1563_s28 }
 0x132   :  { %531 = vrot.lane.b32.xlu1 %v1658_v25, %s1563_s28 }
 0x134   :  { %525 = vrot.lane.b32.xlu0 %v1627_v16, %s1563_s28 }
 0x138   :  { %529 = vrot.lane.b32.xlu0 %v1646_v22, %s1563_s28 }
 0x14c   :  { %v1822_v7 = vpop.f32.mrb[0].mxu1 }
 0x14d   :  { %v1824_v10 = vpop.f32.mrb[1].mxu1 }
 0x14e   :  { %v1830_v14 = vpop.f32.mrb[2].mxu1 }
 0x14f   :  { %v1832_v19 = vpop.f32.mrb[3].mxu1 }
 0x154   :  { %v1838_v44 = vpop.f32.mrb[4].mxu1 }
 0x155   :  { %v1840_v49 = vpop.f32.mrb[5].mxu1 }
 0x156   :  { %v1842_v51 = vpop.f32.mrb[6].mxu1 }
 0x157   :  { %v1844_v52 = vpop.f32.mrb[7].mxu1 }
 0x16e   :  { %v190_v62 = vpop.xlane.xlu1 %189 }
 0x16f   :  { %v184_v0 = vpop.xlane.xlu0 %183  ;;  %v232_v2 = vmul.f32 0.03125, %v190_v62 }
 0x170   :  { %v1826_v11 = vmul.f32 0.03125, %v184_v0 }
 0x171   :  { %v328_v25 = vmul.f32 %v232_v2, %v232_v2  ;;  %v376_v0 = vsub.f32 %v1675_v34, %v232_v2  ;;  %v1863_v34 = vld [vmem:[%s2133_s2 + $0x1] ss:$0 sm:$0xff] }
 0x172   :  { %v193_v21 = vpop.xlane.xlu1 %192  ;;  %v326_v31 = vmul.f32 %v1826_v11, %v1826_v11 }
 0x173   :  { %v233_v3 = vmul.f32 0.03125, %v193_v21  ;;  %v270_v4 = vpop.xlane.xlu0 %269 }
 0x174   :  { %v312_v5 = vmul.f32 0.03125, %v270_v4 }
 0x175   :  { %v329_v22 = vmul.f32 %v233_v3, %v233_v3 }
 0x176   :  { %v344_v6 = vsub.f32 %v312_v5, %v328_v25  ;;  %v273_v16 = vpop.xlane.xlu1 %272 }
 0x177   :  { %v313_v8 = vmul.f32 0.03125, %v273_v16  ;;  %v187_v9 = vpop.xlane.xlu0 %186 }
 0x178   :  { %v360_v12 = vmax.f32 %v344_v6, 0.0  ;;  %v1828_v13 = vmul.f32 0.03125, %v187_v9  ;;  %v377_v6 = vsub.f32 %v1681_v38, %v233_v3 }
 0x179   :  { %v345_v17 = vsub.f32 %v313_v8, %v329_v22 }
 0x17a   :  { %v392_v20 = vadd.f32 1e-05, %v360_v12  ;;  %v327_v26 = vmul.f32 %v1828_v13, %v1828_v13  ;;  %v267_v27 = vpop.xlane.xlu1 %266  ;;  %v375_v38 = vsub.f32 %v1690_v43, %v1828_v13  ;;  %v374_v43 = vsub.f32 %v1678_v36, %v1826_v11 }
 0x17b   :  { %v361_v28 = vmax.f32 %v345_v17, 0.0  ;;  %v311_v29 = vmul.f32 0.03125, %v267_v27  ;;  %v264_v30 = vpop.xlane.xlu0 %263 }
 0x17c   :  { %1499 = vrsqrt.f32 %v392_v20  ;;  %v310_v33 = vmul.f32 0.03125, %v264_v30 }
 0x17d   :  { %v393_v35 = vadd.f32 1e-05, %v361_v28  ;;  %v343_v37 = vsub.f32 %v311_v29, %v327_v26 }
 0x17e   :  { %v342_v40 = vsub.f32 %v310_v33, %v326_v31  ;;  %v205_v42 = vpop.xlane.xlu1 %204 }
 0x17f   :  { %1501 = vrsqrt.f32 %v393_v35  ;;  %v359_v47 = vmax.f32 %v343_v37, 0.0  ;;  %v202_v48 = vpop.xlane.xlu0 %201  ;;  %v1846_v56 = vmul.f32 0.03125, %v205_v42 }
 0x180   :  { %v358_v50 = vmax.f32 %v342_v40, 0.0  ;;  %v1848_v59 = vmul.f32 0.03125, %v202_v48  ;;  %v1875_v40 = vld [vmem:[%s2133_s2 + $0x2] ss:$0 sm:$0xff] }
 0x181   :  { %v391_v32 = vadd.f32 1e-05, %v359_v47  ;;  %v333_v21 = vmul.f32 %v1846_v56, %v1846_v56 }
 0x182   :  { %v390_v53 = vadd.f32 1e-05, %v358_v50  ;;  %v199_v54 = vpop.xlane.xlu1 %198  ;;  %v332_v16 = vmul.f32 %v1848_v59, %v1848_v59 }
 0x183   :  { %1503 = vrsqrt.f32 %v391_v32  ;;  %v196_v58 = vpop.xlane.xlu0 %195  ;;  %v1853_v4 = vmul.f32 0.03125, %v199_v54 }
 0x184   :  { %1505 = vrsqrt.f32 %v390_v53  ;;  %v1858_v22 = vmul.f32 0.03125, %v196_v58 }
 0x185   :  { %v331_v3 = vmul.f32 %v1853_v4, %v1853_v4 }
 0x186   :  { %v1500_v60 = vpop.eup %1499  ;;  %v285_v62 = vpop.xlane.xlu1 %284  ;;  %v330_v31 = vmul.f32 %v1858_v22, %v1858_v22 }
 0x187   :  { %v317_v25 = vmul.f32 0.03125, %v285_v62  ;;  %v282_v5 = vpop.xlane.xlu0 %281  ;;  %v424_v12 = vmul.f32 %v1500_v60, %v376_v0 }
 0x188   :  { %v316_v8 = vmul.f32 0.03125, %v282_v5 }
 0x189   :  { %v1502_v9 = vpop.eup %1501  ;;  %v349_v17 = vsub.f32 %v317_v25, %v333_v21  ;;  %v445_v13 = vmul.f32 %v1863_v34, %v424_v12 }
 0x18a   :  { %v425_v2 = vmul.f32 %v1502_v9, %v377_v6  ;;  %v348_v20 = vsub.f32 %v316_v8, %v332_v16  ;;  %v279_v26 = vpop.xlane.xlu1 %278 }
 0x18b   :  { %v365_v27 = vmax.f32 %v349_v17, 0.0  ;;  %v315_v28 = vmul.f32 0.03125, %v279_v26  ;;  %v276_v29 = vpop.xlane.xlu0 %275  ;;  %v466_v5 = vadd.f32 %v1875_v40, %v445_v13 }
 0x18c   :  { %v446_v30 = vmul.f32 %v1863_v34, %v425_v2  ;;  %v364_v33 = vmax.f32 %v348_v20, 0.0  ;;  %v314_v35 = vmul.f32 0.03125, %v276_v29 }
 0x18d   :  { %v1504_v37 = vpop.eup %1503  ;;  %v397_v42 = vadd.f32 1e-05, %v365_v27  ;;  %v347_v47 = vsub.f32 %v315_v28, %v331_v3 }
 0x18e   :  { %v1506_v48 = vpop.eup %1505  ;;  %v467_v50 = vadd.f32 %v1875_v40, %v446_v30  ;;  %v423_v32 = vmul.f32 %v1504_v37, %v375_v38  ;;  %v396_v53 = vadd.f32 1e-05, %v364_v33  ;;  %v346_v54 = vsub.f32 %v314_v35, %v330_v31  ;;  %v217_v58 = vpop.xlane.xlu1 %216 }
 0x18f   :  { %v422_v60 = vmul.f32 %v1506_v48, %v374_v43  ;;  %1507 = vrsqrt.f32 %v397_v42  ;;  %v363_v62 = vmax.f32 %v347_v47, 0.0  ;;  %v214_v0 = vpop.xlane.xlu0 %213  ;;  %v1884_v8 = vmul.f32 0.03125, %v217_v58 }
 0x190   :  { %v444_v21 = vmul.f32 %v1863_v34, %v423_v32  ;;  %v362_v25 = vmax.f32 %v346_v54, 0.0  ;;  %1509 = vrsqrt.f32 %v396_v53  ;;  %v1888_v2 = vmul.f32 0.03125, %v214_v0 }
 0x191   :  { %v443_v36 = vmul.f32 %v1863_v34, %v422_v60  ;;  %v395_v11 = vadd.f32 1e-05, %v363_v62  ;;  %1511 = vtanh.f32 %v467_v50  ;;  %v337_v26 = vmul.f32 %v1884_v8, %v1884_v8 }
 0x192   :  { %v394_v6 = vadd.f32 1e-05, %v362_v25  ;;  %v211_v16 = vpop.xlane.xlu1 %210  ;;  %v465_v17 = vadd.f32 %v1875_v40, %v444_v21  ;;  %v336_v28 = vmul.f32 %v1888_v2, %v1888_v2  ;;  %v381_v33 = vsub.f32 %v1705_v55, %v1846_v56 }
 0x193   :  { %1513 = vrsqrt.f32 %v395_v11  ;;  %v208_v9 = vpop.xlane.xlu0 %207  ;;  %v464_v12 = vadd.f32 %v1875_v40, %v443_v36  ;;  %v1892_v38 = vmul.f32 0.03125, %v211_v16  ;;  %v380_v37 = vsub.f32 %v1709_v57, %v1848_v59 }
 0x194   :  { %1515 = vrsqrt.f32 %v394_v6  ;;  %v1896_v29 = vmul.f32 0.03125, %v208_v9  ;;  %v379_v43 = vsub.f32 %v1715_v63, %v1853_v4  ;;  %v378_v63 = vsub.f32 %v1718_v1, %v1858_v22 }
 0x195   :  { %1517 = vtanh.f32 %v464_v12  ;;  %v335_v50 = vmul.f32 %v1892_v38, %v1892_v38 }
 0x196   :  { %v297_v20 = vpop.xlane.xlu1 %296  ;;  %1519 = vtanh.f32 %v465_v17  ;;  %v334_v55 = vmul.f32 %v1896_v29, %v1896_v29 }
 0x197   :  { %1521 = vtanh.f32 %v466_v5  ;;  %v321_v3 = vmul.f32 0.03125, %v297_v20  ;;  %v294_v27 = vpop.xlane.xlu0 %293 }
 0x198   :  { %v320_v30 = vmul.f32 0.03125, %v294_v27 }
 0x199   :  { %v1508_v31 = vpop.eup %1507  ;;  %v353_v35 = vsub.f32 %v321_v3, %v337_v26 }
 0x19a   :  { %v352_v13 = vsub.f32 %v320_v30, %v336_v28  ;;  %v291_v42 = vpop.xlane.xlu1 %290  ;;  %v1510_v47 = vpop.eup %1509  ;;  %v429_v48 = vmul.f32 %v1508_v31, %v381_v33 }
 0x19b   :  { %v369_v32 = vmax.f32 %v353_v35, 0.0  ;;  %v319_v53 = vmul.f32 0.03125, %v291_v42  ;;  %v288_v54 = vpop.xlane.xlu0 %287  ;;  %v1512_v58 = vpop.eup %1511  ;;  %v428_v60 = vmul.f32 %v1510_v47, %v380_v37 }
 0x19c   :  { %v368_v56 = vmax.f32 %v352_v13, 0.0  ;;  %v318_v57 = vmul.f32 0.03125, %v288_v54  ;;  %v450_v6 = vmul.f32 %v1863_v34, %v429_v48 }
 0x19d   :  { %v1514_v59 = vpop.eup %1513  ;;  %v401_v4 = vadd.f32 1e-05, %v369_v32  ;;  %v351_v62 = vsub.f32 %v319_v53, %v335_v50  ;;  %v449_v20 = vmul.f32 %v1863_v34, %v428_v60  ;;  %v385_v50 = vsub.f32 %v1737_v15, %v1884_v8 }
 0x19e   :  { %v1516_v0 = vpop.eup %1515  ;;  %v427_v21 = vmul.f32 %v1514_v59, %v379_v43  ;;  %v400_v25 = vadd.f32 1e-05, %v368_v56  ;;  %v350_v36 = vsub.f32 %v318_v57, %v334_v55  ;;  %v229_v11 = vpop.xlane.xlu1 %228  ;;  %v471_v48 = vadd.f32 %v1875_v40, %v450_v6 }
 0x19f   :  { %v1518_v5 = vpop.eup %1517  ;;  %v426_v16 = vmul.f32 %v1516_v0, %v378_v63  ;;  %1523 = vrsqrt.f32 %v401_v4  ;;  %v367_v9 = vmax.f32 %v351_v62, 0.0  ;;  %v226_v12 = vpop.xlane.xlu0 %225  ;;  %v1914_v35 = vmul.f32 0.03125, %v229_v11 }
 0x1a0   :  { %v1520_v17 = vpop.eup %1519  ;;  %v448_v26 = vmul.f32 %v1863_v34, %v427_v21  ;;  %1525 = vrsqrt.f32 %v400_v25  ;;  %v366_v1 = vmax.f32 %v350_v36, 0.0  ;;  %v1918_v42 = vmul.f32 0.03125, %v226_v12 }
 0x1a1   :  { %v1522_v22 = vpop.eup %1521  ;;  %v447_v3 = vmul.f32 %v1863_v34, %v426_v16  ;;  %v399_v27 = vadd.f32 1e-05, %v367_v9  ;;  %v501_v31 = vpack.c.bf16 %v1520_v17, %v1518_v5  ;;  %v470_v47 = vadd.f32 %v1875_v40, %v449_v20 }
 0x1a2   :  { %v398_v28 = vadd.f32 1e-05, %v366_v1  ;;  %v223_v30 = vpop.xlane.xlu1 %222  ;;  %v502_v33 = vpack.c.bf16 %v1512_v58, %v1522_v22  ;;  %v469_v13 = vadd.f32 %v1875_v40, %v448_v26  ;;  %v341_v53 = vmul.f32 %v1914_v35, %v1914_v35 }
 0x1a3   :  { %1527 = vrsqrt.f32 %v399_v27  ;;  %v220_v37 = vpop.xlane.xlu0 %219  ;;  %v468_v43 = vadd.f32 %v1875_v40, %v447_v3  ;;  %1401 = vmatprep.mubr.msk.bf16.mxu0 %vm60_vm0, %v501_v31  ;;  %v1929_v54 = vmul.f32 0.03125, %v223_v30  ;;  %v340_v55 = vmul.f32 %v1918_v42, %v1918_v42 }
 0x1a4   :  { %1529 = vrsqrt.f32 %v398_v28  ;;  %1402 = vmatmul.mubr.msk.bf16.vlgmr.msra.gmra.mrb[16].mxu0 %vm60_vm0, %v502_v33  ;;  %v1933_v56 = vmul.f32 0.03125, %v220_v37  ;;  %v384_v8 = vsub.f32 %v1741_v18, %v1888_v2  ;;  %v383_v63 = vsub.f32 %v1747_v23, %v1892_v38 }
 0x1a5   :  { %1531 = vtanh.f32 %v468_v43  ;;  %1418 = vmatpush3.bf16.msra.mxu0 %v1819_v61  ;;  %v339_v25 = vmul.f32 %v1929_v54, %v1929_v54  ;;  %v382_v23 = vsub.f32 %v1750_v24, %v1896_v29 }
 0x1a6   :  { %v309_v32 = vpop.xlane.xlu1 %308  ;;  %1533 = vtanh.f32 %v469_v13  ;;  %v338_v18 = vmul.f32 %v1933_v56, %v1933_v56 }
 0x1a7   :  { %v325_v58 = vmul.f32 0.03125, %v309_v32  ;;  %v306_v60 = vpop.xlane.xlu0 %305  ;;  %1535 = vtanh.f32 %v470_v47 }
 0x1a8   :  { %v324_v57 = vmul.f32 0.03125, %v306_v60  ;;  %1537 = vtanh.f32 %v471_v48 }
 0x1a9   :  { %v1524_v15 = vpop.eup %1523  ;;  %v357_v61 = vsub.f32 %v325_v58, %v341_v53 }
 0x1aa   :  { %v1526_v59 = vpop.eup %1525  ;;  %v433_v4 = vmul.f32 %v1524_v15, %v385_v50  ;;  %v356_v62 = vsub.f32 %v324_v57, %v340_v55  ;;  %v303_v0 = vpop.xlane.xlu1 %302 }
 0x1ab   :  { %v432_v21 = vmul.f32 %v1526_v59, %v384_v8  ;;  %v373_v36 = vmax.f32 %v357_v61, 0.0  ;;  %v323_v11 = vmul.f32 0.03125, %v303_v0  ;;  %v300_v5 = vpop.xlane.xlu0 %299  ;;  %v389_v8 = vsub.f32 %v1769_v39, %v1914_v35 }
 0x1ac   :  { %v454_v6 = vmul.f32 %v1863_v34, %v433_v4  ;;  %v372_v2 = vmax.f32 %v356_v62, 0.0  ;;  %v322_v16 = vmul.f32 0.03125, %v300_v5  ;;  %v388_v62 = vsub.f32 %v1773_v41, %v1918_v42 }
 0x1ad   :  { %v1528_v9 = vpop.eup %1527  ;;  %v453_v38 = vmul.f32 %v1863_v34, %v432_v21  ;;  %v405_v12 = vadd.f32 1e-05, %v373_v36  ;;  %v355_v17 = vsub.f32 %v323_v11, %v339_v25  ;;  %v387_v21 = vsub.f32 %v1779_v45, %v1929_v54 }
 0x1ae   :  { %v1530_v20 = vpop.eup %1529  ;;  %v475_v26 = vadd.f32 %v1875_v40, %v454_v6  ;;  %v431_v1 = vmul.f32 %v1528_v9, %v383_v63  ;;  %v404_v22 = vadd.f32 1e-05, %v372_v2  ;;  %v354_v3 = vsub.f32 %v322_v16, %v338_v18  ;;  %v528_v27 = vpop.permute.xlu1 %527 }
 0x1af   :  { %v1532_v28 = vpop.eup %1531  ;;  %v474_v30 = vadd.f32 %v1875_v40, %v453_v38  ;;  %v430_v31 = vmul.f32 %v1530_v20, %v382_v23  ;;  %1539 = vrsqrt.f32 %v405_v12  ;;  %v371_v33 = vmax.f32 %v355_v17, 0.0  ;;  %v526_v37 = vpop.permute.xlu0 %525 }
 0x1b0   :  { %v1534_v43 = vpop.eup %1533  ;;  %1541 = vtanh.f32 %v475_v26  ;;  %v452_v24 = vmul.f32 %v1863_v34, %v431_v1  ;;  %v370_v29 = vmax.f32 %v354_v3, 0.0  ;;  %1389 = vmatprep.mubr.msk.bf16.mxu1 %vm533_vm2, %v526_v37  ;;  %v386_v11 = vsub.f32 %v1782_v46, %v1933_v56  ;;  %v1492_v1 = vld [vmem:[%s2131_s1 + $0x30] sm:$0xff]   ;;  %v1495_v3 = vld [vmem:[%s2131_s1 + $0x48] sm:$0xff]  }
 0x1b1   :  { %v1536_v13 = vpop.eup %1535  ;;  %1543 = vtanh.f32 %v474_v30  ;;  %v451_v47 = vmul.f32 %v1863_v34, %v430_v31  ;;  %v403_v48 = vadd.f32 1e-05, %v371_v33  ;;  %v503_v50 = vpack.c.bf16 %v1534_v43, %v1532_v28  ;;  %1390 = vmatmul.mubr.msk.bf16.gmra.mrb[8].mxu1 %vm533_vm2, %v528_v27  ;;  %1419 = vmatprep.subr.bf16.mxu0 %v1492_v1  ;;  %v1496_v27 = vld [vmem:[%s2131_s1 + $0x50] sm:$0xff]   ;;  %v1997_v30 = vld [vmem:[%s2133_s2 + $0x3] ss:$0 sm:$0xff] }
 0x1b2   :  { %v1538_v32 = vpop.eup %1537  ;;  %1545 = vrsqrt.f32 %v404_v22  ;;  %v402_v53 = vadd.f32 1e-05, %v370_v29  ;;  %v473_v58 = vadd.f32 %v1875_v40, %v452_v24  ;;  %v532_v15 = vpop.permute.xlu1 %531  ;;  %1420 = vmatpush3.bf16.msra.mxu0 %v1492_v1  ;;  %v1494_v22 = vld [vmem:[%s2131_s1 + $0x40] sm:$0xff]   ;;  %1441 = vmatprep.subr.bf16.mxu1 %v1495_v3 }
 0x1b3   :  { %1547 = vrsqrt.f32 %v403_v48  ;;  %1405 = vmatprep.mubr.msk.bf16.mxu0 %vm60_vm0, %v503_v50  ;;  %v504_v60 = vpack.c.bf16 %v1538_v32, %v1536_v13  ;;  %v530_v55 = vpop.permute.xlu0 %529  ;;  %v472_v57 = vadd.f32 %v1875_v40, %v451_v47 }
 0x1b4   :  { %1549 = vrsqrt.f32 %v402_v53  ;;  %1393 = vmatprep.mubr.msk.bf16.mxu1 %vm533_vm2, %v530_v55 }
 0x1b5   :  { %1406 = vmatmul.mubr.msk.bf16.gmra.mrb[20].mxu0 %vm60_vm0, %v504_v60  ;;  %1551 = vtanh.f32 %v472_v57 }
 0x1b6   :  { %1553 = vtanh.f32 %v473_v58 }
 0x1b9   :  { %v1540_v61 = vpop.eup %1539  ;;  %1394 = vmatmul.mubr.msk.bf16.gmra.mrb[12].mxu1 %vm533_vm2, %v532_v15 }
 0x1ba   :  { %v1542_v59 = vpop.eup %1541  ;;  %v437_v63 = vmul.f32 %v1540_v61, %v389_v8 }
 0x1bb   :  { %v1544_v4 = vpop.eup %1543 }
 0x1bc   :  { %v1546_v0 = vpop.eup %1545  ;;  %v458_v25 = vmul.f32 %v1863_v34, %v437_v63  ;;  %v506_v23 = vpack.c.bf16 %v1542_v59, %v1544_v4 }
 0x1bd   :  { %v1548_v36 = vpop.eup %1547  ;;  %v436_v39 = vmul.f32 %v1546_v0, %v388_v62 }
 0x1be   :  { %v1550_v35 = vpop.eup %1549  ;;  %v435_v5 = vmul.f32 %v1548_v36, %v387_v21  ;;  %v479_v6 = vadd.f32 %v1875_v40, %v458_v25 }
 0x1bf   :  { %v1552_v18 = vpop.eup %1551  ;;  %v457_v2 = vmul.f32 %v1863_v34, %v436_v39  ;;  %v434_v16 = vmul.f32 %v1550_v35, %v386_v11 }
 0x1c0   :  { %v1554_v41 = vpop.eup %1553  ;;  %v456_v42 = vmul.f32 %v1863_v34, %v435_v5  ;;  %1555 = vtanh.f32 %v479_v6 }
 0x1c1   :  { %v455_v45 = vmul.f32 %v1863_v34, %v434_v16  ;;  %v505_v54 = vpack.c.bf16 %v1554_v41, %v1552_v18  ;;  %v478_v9 = vadd.f32 %v1875_v40, %v457_v2 }
 0x1c2   :  { %v477_v46 = vadd.f32 %v1875_v40, %v456_v42 }
 0x1c3   :  { %1409 = vmatprep.mubr.msk.bf16.mxu1 %vm60_vm0, %v505_v54  ;;  %v476_v56 = vadd.f32 %v1875_v40, %v455_v45  ;;  %1557 = vtanh.f32 %v478_v9  ;;  %v1493_v40 = vld [vmem:[%s2131_s1 + $0x38] sm:$0xff]  }
 0x1c4   :  { %1410 = vmatmul.mubr.msk.bf16.vlgmr.msra.gmra.mrb[8].mxu1 %vm60_vm0, %v506_v23  ;;  %1559 = vtanh.f32 %v477_v46  ;;  %1421 = vmatprep.subr.bf16.mxu0 %v1493_v40 }
 0x1c5   :  { %1561 = vtanh.f32 %v476_v56  ;;  %1422 = vmatpush3.bf16.msra.mxu0 %v1493_v40  ;;  %1442 = vmatpush3.bf16.msra.mxu1 %v1495_v3 }
 0x1c6   :  { %1423 = vmatprep.subr.bf16.mxu0 %v1494_v22  ;;  %1443 = vmatprep.subr.bf16.mxu1 %v1496_v27 }
 0x1c9   :  { %1424 = vmatpush3.bf16.msra.mxu0 %v1494_v22  ;;  %1444 = vmatpush3.bf16.msra.mxu1 %v1496_v27 }
 0x1ca   :  { %v1556_v38 = vpop.eup %1555 }
 0x1cd   :  { %v1558_v12 = vpop.eup %1557 }
 0x1ce   :  { %v1560_v17 = vpop.eup %1559  ;;  %v508_v26 = vpack.c.bf16 %v1556_v38, %v1558_v12 }
 0x1cf   :  { %v1562_v34 = vpop.eup %1561 }
 0x1d0   :  { %v507_v20 = vpack.c.bf16 %v1560_v17, %v1562_v34 }
 0x1d2   :  { %1413 = vmatprep.mubr.msk.bf16.mxu1 %vm60_vm0, %v507_v20 }
 0x1d3   :  { %1414 = vmatmul.mubr.msk.bf16.gmra.mrb[12].mxu1 %vm60_vm0, %v508_v26 }
 0x277   :  { %v1403_v28 = vpop.f32.mrb[16].mxu0 }
 0x278   :  { %v738_v31 = vadd.f32 %v1403_v28, %v1822_v7  ;;  %v729_v33 = vpop.f32.mrb[17].mxu0 }
 0x279   :  { %v730_v37 = vadd.f32 %v729_v33, %v1824_v10  ;;  %v1404_v43 = vpop.f32.mrb[18].mxu0  ;;  %v1498_v33 = vld [vmem:[%s2131_s1 + $0x60] sm:$0xff]  }
 0x27a   :  { %v799_v24 = vadd.f32 %v1997_v30, %v738_v31  ;;  %v741_v29 = vadd.f32 %v1404_v43, %v1830_v14  ;;  %v732_v13 = vpop.f32.mrb[19].mxu0  ;;  %v1497_v31 = vld [vmem:[%s2131_s1 + $0x58] sm:$0xff]  }
 0x27b   :  { %v797_v47 = vadd.f32 %v1997_v30, %v730_v37  ;;  %v733_v48 = vadd.f32 %v732_v13, %v1832_v19  ;;  %1445 = vmatprep.subr.bf16.mxu1 %v1497_v31 }
 0x27c   :  { %v800_v50 = vadd.f32 %v1997_v30, %v741_v29  ;;  %v815_v53 = vmax.f32 %v799_v24, 0.0  ;;  %1446 = vmatpush3.bf16.msra.mxu1 %v1497_v31 }
 0x27d   :  { %v798_v32 = vadd.f32 %v1997_v30, %v733_v48  ;;  %v813_v7 = vmax.f32 %v797_v47, 0.0  ;;  %1447 = vmatprep.subr.bf16.mxu1 %v1498_v33 }
 0x27e   :  { %v816_v58 = vmax.f32 %v800_v50, 0.0 }
 0x27f   :  { %v814_v60 = vmax.f32 %v798_v32, 0.0 }
 0x280   :  { %v838_v55 = vpack.c.bf16 %v816_v58, %v815_v53  ;;  %1448 = vmatpush3.bf16.msra.mxu1 %v1498_v33 }
 0x281   :  { %v837_v10 = vpack.c.bf16 %v814_v60, %v813_v7 }
 0x283   :  { %1425 = vmatprep.mubr.msk.bf16.mxu0 %vm874_vm3, %v837_v10 }
 0x284   :  { %1426 = vmatmul.mubr.msk.bf16.vlgmr.msra.gmra.mrb[24].mxu0 %vm874_vm3, %v838_v55 }
 0x288   :  { %v1407_v14 = vpop.f32.mrb[20].mxu0 }
 0x289   :  { %v754_v57 = vadd.f32 %v1407_v14, %v1838_v44  ;;  %v745_v15 = vpop.f32.mrb[21].mxu0 }
 0x28a   :  { %v746_v19 = vadd.f32 %v745_v15, %v1840_v49  ;;  %v1408_v8 = vpop.f32.mrb[22].mxu0 }
 0x28b   :  { %v803_v61 = vadd.f32 %v1997_v30, %v754_v57  ;;  %v757_v59 = vadd.f32 %v1408_v8, %v1842_v51  ;;  %v748_v63 = vpop.f32.mrb[23].mxu0 }
 0x28c   :  { %v801_v4 = vadd.f32 %v1997_v30, %v746_v19  ;;  %v749_v62 = vadd.f32 %v748_v63, %v1844_v52 }
 0x28d   :  { %v804_v0 = vadd.f32 %v1997_v30, %v757_v59  ;;  %v819_v25 = vmax.f32 %v803_v61, 0.0 }
 0x28e   :  { %v802_v21 = vadd.f32 %v1997_v30, %v749_v62  ;;  %v817_v44 = vmax.f32 %v801_v4, 0.0 }
 0x28f   :  { %v820_v36 = vmax.f32 %v804_v0, 0.0 }
 0x290   :  { %v818_v11 = vmax.f32 %v802_v21, 0.0 }
 0x291   :  { %v840_v39 = vpack.c.bf16 %v820_v36, %v819_v25 }
 0x292   :  { %v839_v49 = vpack.c.bf16 %v818_v11, %v817_v44 }
 0x294   :  { %1429 = vmatprep.mubr.msk.bf16.mxu0 %vm874_vm3, %v839_v49 }
 0x295   :  { %1430 = vmatmul.mubr.msk.bf16.gmra.mrb[28].mxu0 %vm874_vm3, %v840_v39 }
 0x297   :  { %v1411_v51 = vpop.f32.mrb[8].mxu1 }
 0x298   :  { %v807_v35 = vadd.f32 %v1411_v51, %v1997_v30  ;;  %v761_v5 = vpop.f32.mrb[9].mxu1 }
 0x299   :  { %v805_v52 = vadd.f32 %v1997_v30, %v761_v5  ;;  %v1412_v6 = vpop.f32.mrb[10].mxu1 }
 0x29a   :  { %v808_v18 = vadd.f32 %v1412_v6, %v1997_v30  ;;  %v764_v2 = vpop.f32.mrb[11].mxu1  ;;  %v823_v41 = vmax.f32 %v807_v35, 0.0 }
 0x29b   :  { %v806_v16 = vadd.f32 %v1997_v30, %v764_v2  ;;  %v821_v45 = vmax.f32 %v805_v52, 0.0 }
 0x29c   :  { %v824_v42 = vmax.f32 %v808_v18, 0.0 }
 0x29d   :  { %v822_v54 = vmax.f32 %v806_v16, 0.0 }
 0x29e   :  { %v842_v9 = vpack.c.bf16 %v824_v42, %v823_v41 }
 0x29f   :  { %v841_v23 = vpack.c.bf16 %v822_v54, %v821_v45 }
 0x2a1   :  { %1433 = vmatprep.mubr.msk.bf16.mxu0 %vm874_vm3, %v841_v23 }
 0x2a2   :  { %1434 = vmatmul.mubr.msk.bf16.gmra.mrb[32].mxu0 %vm874_vm3, %v842_v9 }
 0x2a6   :  { %v1415_v46 = vpop.f32.mrb[12].mxu1 }
 0x2a7   :  { %v811_v56 = vadd.f32 %v1415_v46, %v1997_v30  ;;  %v777_v38 = vpop.f32.mrb[13].mxu1 }
 0x2a8   :  { %v809_v12 = vadd.f32 %v1997_v30, %v777_v38  ;;  %v1416_v17 = vpop.f32.mrb[14].mxu1 }
 0x2a9   :  { %v812_v34 = vadd.f32 %v1416_v17, %v1997_v30  ;;  %v780_v20 = vpop.f32.mrb[15].mxu1  ;;  %v827_v1 = vmax.f32 %v811_v56, 0.0 }
 0x2aa   :  { %v810_v26 = vadd.f32 %v1997_v30, %v780_v20  ;;  %v825_v22 = vmax.f32 %v809_v12, 0.0  ;;  %v1280_v30 = vld [vmem:[%s2133_s2 + $0x4] ss:$0 sm:$0xff] }
 0x2ab   :  { %v828_v40 = vmax.f32 %v812_v34, 0.0 }
 0x2ac   :  { %v826_v3 = vmax.f32 %v810_v26, 0.0 }
 0x2ad   :  { %v844_v27 = vpack.c.bf16 %v828_v40, %v827_v1  ;;  %v1293_v40 = vld [vmem:[%s2133_s2 + $0x5] ss:$0 sm:$0xff] }
 0x2ae   :  { %v843_v28 = vpack.c.bf16 %v826_v3, %v825_v22 }
 0x2b0   :  { %1437 = vmatprep.mubr.msk.bf16.mxu0 %vm874_vm3, %v843_v28 }
 0x2b1   :  { %1438 = vmatmul.mubr.msk.bf16.gmra.mrb[36].mxu0 %vm874_vm3, %v844_v27 }
 0x357   :  { %v1427_v37 = vpop.f32.mrb[24].mxu0 }
 0x358   :  { %v942_v43 = vadd.f32 %v1427_v37, %v1280_v30  ;;  %v933_v24 = vpop.f32.mrb[25].mxu0 }
 0x359   :  { %v934_v29 = vadd.f32 %v1280_v30, %v933_v24  ;;  %v1428_v13 = vpop.f32.mrb[26].mxu0 }
 0x35a   :  { %v945_v47 = vadd.f32 %v1428_v13, %v1280_v30  ;;  %v936_v48 = vpop.f32.mrb[27].mxu0  ;;  %v998_v32 = vmax.f32 %v942_v43, 0.0 }
 0x35b   :  { %v937_v50 = vadd.f32 %v1280_v30, %v936_v48  ;;  %v996_v58 = vmax.f32 %v934_v29, 0.0 }
 0x35c   :  { %v999_v53 = vmax.f32 %v945_v47, 0.0 }
 0x35d   :  { %v997_v7 = vmax.f32 %v937_v50, 0.0 }
 0x35e   :  { %v1021_v60 = vpack.c.bf16 %v999_v53, %v998_v32 }
 0x35f   :  { %v1020_v55 = vpack.c.bf16 %v997_v7, %v996_v58 }
 0x361   :  { %1449 = vmatprep.mubr.msk.bf16.mxu1 %vm874_vm3, %v1020_v55 }
 0x362   :  { %1450 = vmatmul.mubr.msk.bf16.vlgmr.msra.gmra.mrb[16].mxu1 %vm874_vm3, %v1021_v60 }
 0x368   :  { %v1431_v10 = vpop.f32.mrb[28].mxu0 }
 0x369   :  { %v958_v14 = vadd.f32 %v1431_v10, %v1280_v30  ;;  %v949_v57 = vpop.f32.mrb[29].mxu0 }
 0x36a   :  { %v950_v15 = vadd.f32 %v1280_v30, %v949_v57  ;;  %v1432_v19 = vpop.f32.mrb[30].mxu0 }
 0x36b   :  { %v961_v8 = vadd.f32 %v1432_v19, %v1280_v30  ;;  %v952_v61 = vpop.f32.mrb[31].mxu0  ;;  %v1002_v63 = vmax.f32 %v958_v14, 0.0 }
 0x36c   :  { %v953_v59 = vadd.f32 %v1280_v30, %v952_v61  ;;  %v1000_v62 = vmax.f32 %v950_v15, 0.0 }
 0x36d   :  { %v1003_v4 = vmax.f32 %v961_v8, 0.0 }
 0x36e   :  { %v1001_v0 = vmax.f32 %v953_v59, 0.0 }
 0x36f   :  { %v1023_v21 = vpack.c.bf16 %v1003_v4, %v1002_v63 }
 0x370   :  { %v1022_v25 = vpack.c.bf16 %v1001_v0, %v1000_v62 }
 0x372   :  { %1453 = vmatprep.mubr.msk.bf16.mxu1 %vm874_vm3, %v1022_v25 }
 0x373   :  { %1454 = vmatmul.mubr.msk.bf16.gmra.mrb[20].mxu1 %vm874_vm3, %v1023_v21 }
 0x375   :  { %v1435_v36 = vpop.f32.mrb[32].mxu0 }
 0x376   :  { %v974_v44 = vadd.f32 %v1435_v36, %v1280_v30  ;;  %v965_v11 = vpop.f32.mrb[33].mxu0 }
 0x377   :  { %v966_v39 = vadd.f32 %v1280_v30, %v965_v11  ;;  %v1436_v49 = vpop.f32.mrb[34].mxu0 }
 0x378   :  { %v977_v51 = vadd.f32 %v1436_v49, %v1280_v30  ;;  %v968_v35 = vpop.f32.mrb[35].mxu0  ;;  %v1006_v52 = vmax.f32 %v974_v44, 0.0 }
 0x379   :  { %v969_v5 = vadd.f32 %v1280_v30, %v968_v35  ;;  %v1004_v18 = vmax.f32 %v966_v39, 0.0 }
 0x37a   :  { %v1007_v6 = vmax.f32 %v977_v51, 0.0 }
 0x37b   :  { %v1005_v2 = vmax.f32 %v969_v5, 0.0 }
 0x37c   :  { %v1025_v16 = vpack.c.bf16 %v1007_v6, %v1006_v52 }
 0x37d   :  { %v1024_v41 = vpack.c.bf16 %v1005_v2, %v1004_v18 }
 0x37f   :  { %1457 = vmatprep.mubr.msk.bf16.mxu1 %vm874_vm3, %v1024_v41 }
 0x380   :  { %1458 = vmatmul.mubr.msk.bf16.gmra.mrb[24].mxu1 %vm874_vm3, %v1025_v16 }
 0x384   :  { %v1439_v42 = vpop.f32.mrb[36].mxu0 }
 0x385   :  { %v990_v45 = vadd.f32 %v1439_v42, %v1280_v30  ;;  %v981_v54 = vpop.f32.mrb[37].mxu0 }
 0x386   :  { %v982_v9 = vadd.f32 %v1280_v30, %v981_v54  ;;  %v1440_v23 = vpop.f32.mrb[38].mxu0 }
 0x387   :  { %v993_v46 = vadd.f32 %v1440_v23, %v1280_v30  ;;  %v984_v56 = vpop.f32.mrb[39].mxu0  ;;  %v1010_v12 = vmax.f32 %v990_v45, 0.0 }
 0x388   :  { %v985_v38 = vadd.f32 %v1280_v30, %v984_v56  ;;  %v1008_v34 = vmax.f32 %v982_v9, 0.0 }
 0x389   :  { %v1011_v17 = vmax.f32 %v993_v46, 0.0 }
 0x38a   :  { %v1009_v20 = vmax.f32 %v985_v38, 0.0 }
 0x38b   :  { %v1027_v26 = vpack.c.bf16 %v1011_v17, %v1010_v12 }
 0x38c   :  { %v1026_v1 = vpack.c.bf16 %v1009_v20, %v1008_v34 }
 0x38e   :  { %1461 = vmatprep.mubr.msk.bf16.mxu1 %vm874_vm3, %v1026_v1 }
 0x38f   :  { %1462 = vmatmul.mubr.msk.bf16.gmra.mrb[28].mxu1 %vm874_vm3, %v1027_v26 }
 0x435   :  { %v1451_v22 = vpop.f32.mrb[16].mxu1 }
 0x436   :  { %v1124_v3 = vadd.f32 %v1451_v22, %v1293_v40  ;;  %v1115_v27 = vpop.f32.mrb[17].mxu1 }
 0x437   :  { %v1452_v28 = vpop.f32.mrb[18].mxu1  ;;  %v1116_v31 = vadd.f32 %v1293_v40, %v1115_v27 }
 0x438   :  { %v1118_v33 = vpop.f32.mrb[19].mxu1  ;;  %v1185_v30 = vsel %vm1178_vm4, %v1124_v3, inf  ;;  %v1127_v24 = vadd.f32 %v1452_v28, %v1293_v40 }
 0x439   :  { %v1119_v37 = vadd.f32 %v1293_v40, %v1118_v33  ;;  %1186 = vmin.xlane.f32.xlu0 %v1185_v30  ;;  %v1179_v29 = vsel %vm1178_vm4, %v1116_v31, inf }
 0x43a   :  { %v1188_v13 = vsel %vm1178_vm4, %v1127_v24, inf }
 0x43b   :  { %v1182_v43 = vsel %vm1178_vm4, %v1119_v37, inf }
 0x43c   :  { %1183 = vmin.xlane.f32.xlu1 %v1182_v43 }
 0x43d   :  { %1180 = vmin.xlane.f32.xlu0 %v1179_v29 }
 0x441   :  { %1189 = vmin.xlane.f32.xlu0 %v1188_v13 }
 0x446   :  { %v1455_v47 = vpop.f32.mrb[20].mxu1 }
 0x447   :  { %v1140_v48 = vadd.f32 %v1455_v47, %v1293_v40  ;;  %v1131_v50 = vpop.f32.mrb[21].mxu1 }
 0x448   :  { %v1456_v32 = vpop.f32.mrb[22].mxu1  ;;  %v1132_v53 = vadd.f32 %v1293_v40, %v1131_v50 }
 0x449   :  { %v1143_v58 = vadd.f32 %v1456_v32, %v1293_v40  ;;  %v1134_v7 = vpop.f32.mrb[23].mxu1  ;;  %v1197_v60 = vsel %vm1178_vm4, %v1140_v48, inf }
 0x44a   :  { %1198 = vmin.xlane.f32.xlu0 %v1197_v60  ;;  %v1135_v55 = vadd.f32 %v1293_v40, %v1134_v7  ;;  %v1191_v14 = vsel %vm1178_vm4, %v1132_v53, inf }
 0x44b   :  { %v1200_v10 = vsel %vm1178_vm4, %v1143_v58, inf }
 0x44c   :  { %1201 = vmin.xlane.f32.xlu1 %v1200_v10  ;;  %v1194_v57 = vsel %vm1178_vm4, %v1135_v55, inf }
 0x44e   :  { %1192 = vmin.xlane.f32.xlu0 %v1191_v14 }
 0x450   :  { %1195 = vmin.xlane.f32.xlu1 %v1194_v57 }
 0x453   :  { %v1459_v15 = vpop.f32.mrb[24].mxu1 }
 0x454   :  { %v1156_v19 = vadd.f32 %v1459_v15, %v1293_v40  ;;  %v1147_v8 = vpop.f32.mrb[25].mxu1 }
 0x455   :  { %v1460_v61 = vpop.f32.mrb[26].mxu1  ;;  %v1148_v59 = vadd.f32 %v1293_v40, %v1147_v8 }
 0x456   :  { %v1159_v63 = vadd.f32 %v1460_v61, %v1293_v40  ;;  %v1150_v4 = vpop.f32.mrb[27].mxu1  ;;  %v1209_v62 = vsel %vm1178_vm4, %v1156_v19, inf }
 0x457   :  { %1210 = vmin.xlane.f32.xlu0 %v1209_v62  ;;  %v1151_v0 = vadd.f32 %v1293_v40, %v1150_v4  ;;  %v1203_v25 = vsel %vm1178_vm4, %v1148_v59, inf }
 0x458   :  { %v1212_v21 = vsel %vm1178_vm4, %v1159_v63, inf }
 0x459   :  { %1213 = vmin.xlane.f32.xlu1 %v1212_v21  ;;  %v1206_v36 = vsel %vm1178_vm4, %v1151_v0, inf }
 0x45b   :  { %1204 = vmin.xlane.f32.xlu0 %v1203_v25 }
 0x45d   :  { %1207 = vmin.xlane.f32.xlu1 %v1206_v36 }
 0x462   :  { %v1463_v44 = vpop.f32.mrb[28].mxu1 }
 0x463   :  { %v1163_v11 = vpop.f32.mrb[29].mxu1  ;;  %v1172_v35 = vadd.f32 %v1463_v44, %v1293_v40 }
 0x464   :  { %v1164_v39 = vadd.f32 %v1293_v40, %v1163_v11  ;;  %v1464_v49 = vpop.f32.mrb[30].mxu1 }
 0x465   :  { %v1166_v51 = vpop.f32.mrb[31].mxu1  ;;  %v1175_v6 = vadd.f32 %v1464_v49, %v1293_v40  ;;  %v1221_v2 = vsel %vm1178_vm4, %v1172_v35, inf }
 0x466   :  { %v1167_v5 = vadd.f32 %v1293_v40, %v1166_v51  ;;  %v1215_v52 = vsel %vm1178_vm4, %v1164_v39, inf }
 0x467   :  { %1216 = vmin.xlane.f32.xlu0 %v1215_v52  ;;  %v1224_v16 = vsel %vm1178_vm4, %v1175_v6, inf }
 0x468   :  { %v1218_v18 = vsel %vm1178_vm4, %v1167_v5, inf }
 0x469   :  { %1219 = vmin.xlane.f32.xlu1 %v1218_v18 }
 0x46b   :  { %1222 = vmin.xlane.f32.xlu0 %v1221_v2 }
 0x46d   :  { %1225 = vmin.xlane.f32.xlu1 %v1224_v16 }
 0x4c6   :  { %v1187_v41 = vpop.xlane.xlu0 %1186 }
 0x4c7   :  { %1230 = vst.msk [vmem:[%s2134_s3 + $0x10] sm:$0xff] %vm1227_vm5, %v1187_v41 }
 0x4c9   :  { %v1184_v42 = vpop.xlane.xlu1 %1183 }
 0x4ca   :  { %1229 = vst.msk [vmem:[%s2134_s3 + $0x8] sm:$0xff] %vm1227_vm5, %v1184_v42  ;;  %v1181_v45 = vpop.xlane.xlu0 %1180 }
 0x4cb   :  { %1228 = vst.msk [vmem:[%s2134_s3] sm:$0xff] %vm1227_vm5, %v1181_v45 }
 0x4ce   :  { %v1190_v54 = vpop.xlane.xlu0 %1189 }
 0x4cf   :  { %1231 = vst.msk [vmem:[%s2134_s3 + $0x18] sm:$0xff] %vm1227_vm5, %v1190_v54 }
 0x4d7   :  { %v1199_v9 = vpop.xlane.xlu0 %1198 }
 0x4d8   :  { %1234 = vst.msk [vmem:[%s2134_s3 + $0x30] sm:$0xff] %vm1227_vm5, %v1199_v9 }
 0x4d9   :  { %v1202_v23 = vpop.xlane.xlu1 %1201 }
 0x4da   :  { %1235 = vst.msk [vmem:[%s2134_s3 + $0x38] sm:$0xff] %vm1227_vm5, %v1202_v23 }
 0x4db   :  { %v1193_v46 = vpop.xlane.xlu0 %1192 }
 0x4dc   :  { %1232 = vst.msk [vmem:[%s2134_s3 + $0x20] sm:$0xff] %vm1227_vm5, %v1193_v46 }
 0x4dd   :  { %v1196_v56 = vpop.xlane.xlu1 %1195 }
 0x4de   :  { %1233 = vst.msk [vmem:[%s2134_s3 + $0x28] sm:$0xff] %vm1227_vm5, %v1196_v56 }
 0x4e4   :  { %v1211_v38 = vpop.xlane.xlu0 %1210 }
 0x4e5   :  { %1238 = vst.msk [vmem:[%s2134_s3 + $0x50] sm:$0xff] %vm1227_vm5, %v1211_v38 }
 0x4e6   :  { %v1214_v12 = vpop.xlane.xlu1 %1213 }
 0x4e7   :  { %1239 = vst.msk [vmem:[%s2134_s3 + $0x58] sm:$0xff] %vm1227_vm5, %v1214_v12 }
 0x4e8   :  { %v1205_v17 = vpop.xlane.xlu0 %1204 }
 0x4e9   :  { %1236 = vst.msk [vmem:[%s2134_s3 + $0x40] sm:$0xff] %vm1227_vm5, %v1205_v17 }
 0x4ea   :  { %v1208_v34 = vpop.xlane.xlu1 %1207 }
 0x4eb   :  { %1237 = vst.msk [vmem:[%s2134_s3 + $0x48] sm:$0xff] %vm1227_vm5, %v1208_v34 }
 0x4f4   :  { %v1217_v20 = vpop.xlane.xlu0 %1216 }
 0x4f5   :  { %1240 = vst.msk [vmem:[%s2134_s3 + $0x60] sm:$0xff] %vm1227_vm5, %v1217_v20 }
 0x4f6   :  { %v1220_v26 = vpop.xlane.xlu1 %1219 }
 0x4f7   :  { %1241 = vst.msk [vmem:[%s2134_s3 + $0x68] sm:$0xff] %vm1227_vm5, %v1220_v26 }
 0x4f8   :  { %v1223_v1 = vpop.xlane.xlu0 %1222 }
 0x4f9   :  { %1242 = vst.msk [vmem:[%s2134_s3 + $0x70] sm:$0xff] %vm1227_vm5, %v1223_v1 }
 0x4fa   :  { %v1226_v40 = vpop.xlane.xlu1 %1225 }
 0x4fb   :  { %1243 = vst.msk [vmem:[%s2134_s3 + $0x78] sm:$0xff] %vm1227_vm5, %v1226_v40 }

</bundles_post_ra>
